<compile_context>
chip_gen: v7x
topology: tpu7x:2x2x1
jax: 0.10.0
libtpu: 0.0.40
codegen_flags: <defaults>
</compile_context>

<pallas_src>
import jax
import jax.numpy as jnp
from jax import lax
from jax.experimental import pallas as pl
from jax.experimental.pallas import tpu as pltpu


def attention_kernel(static_ref, dec_ref, v_ref, w1_ref, w2_ref, out_ref):
    static = static_ref[...]          # (TB, H, S)
    dec = dec_ref[...]                # (TB, H, 1)
    v = v_ref[...]                    # (1, H)
    w1 = w1_ref[...]                  # (H, H)  = W[:, :H]
    w2 = w2_ref[...]                  # (H, H)  = W[:, H:]
    TB, H, S = static.shape

    bmm = (((2,), (1,)), ((0,), (0,)))   # batched (b,m,k) @ (b,k,n) -> (b,m,n)

    # z[b, h, s] = sum_k W1[h, k] * static[b, k, s]
    z = lax.dot_general(jnp.broadcast_to(w1, (TB, H, H)), static,
                        dimension_numbers=bmm,
                        preferred_element_type=jnp.float32)        # (TB, H, S)

    # bias[b, h, 0] = sum_k W2[h, k] * dec[b, k]   (replaces concat + broadcast)
    bias = lax.dot_general(jnp.broadcast_to(w2, (TB, H, H)), dec,
                           dimension_numbers=bmm,
                           preferred_element_type=jnp.float32)     # (TB, H, 1)

    scores = jnp.tanh(z + bias)                                    # (TB, H, S)

    # attn[b, 0, s] = sum_h v[h] * scores[b, h, s]
    attn = lax.dot_general(jnp.broadcast_to(v, (TB, 1, H)), scores,
                           dimension_numbers=bmm,
                           preferred_element_type=jnp.float32)     # (TB, 1, S)

    # softmax over the sequence axis (PyTorch dim=2)
    attn = attn - jnp.max(attn, axis=-1, keepdims=True)
    e = jnp.exp(attn)
    out_ref[...] = (e / jnp.sum(e, axis=-1, keepdims=True)).astype(out_ref.dtype)


def _batch_tile(B, max_tb=64):
    # Largest batch tile <= max_tb that divides B and keeps the sublane dim aligned;
    # fall back to the full (small/odd) batch as a single block.
    for tb in (64, 32, 16, 8):
        if tb <= max_tb and B % tb == 0:
            return tb
    return B


def attention_forward(static_hidden, decoder_hidden, v, W):
    B, H, S = static_hidden.shape
    TB = _batch_tile(B)

    # Parameter-side plumbing (tiny, done once per call in plain XLA).
    w1 = W[0, :, :H]                          # (H, H)
    w2 = W[0, :, H:]                          # (H, H)
    v2 = v.reshape(1, H)                      # (1, H)
    dec3 = decoder_hidden.reshape(B, H, 1)    # metadata-only reshape

    return pl.pallas_call(
        attention_kernel,
        out_shape=jax.ShapeDtypeStruct((B, 1, S), static_hidden.dtype),
        grid_spec=pltpu.PrefetchScalarGridSpec(
            num_scalar_prefetch=0,
            grid=(B // TB,),
            in_specs=[
                pl.BlockSpec((TB, H, S), lambda i: (i, 0, 0)),   # static_hidden
                pl.BlockSpec((TB, H, 1), lambda i: (i, 0, 0)),   # decoder_hidden
                pl.BlockSpec((1, H), lambda i: (0, 0)),          # v       (VMEM resident)
                pl.BlockSpec((H, H), lambda i: (0, 0)),          # W1      (VMEM resident)
                pl.BlockSpec((H, H), lambda i: (0, 0)),          # W2      (VMEM resident)
            ],
            out_specs=pl.BlockSpec((TB, 1, S), lambda i: (i, 0, 0)),
        ),
        compiler_params=pltpu.CompilerParams(
            dimension_semantics=("parallel",),
            vmem_limit_bytes=32 * 1024 * 1024,
        ),
    )(static_hidden, dec3, v2, w1, w2)


def attention_reference(static_hidden, decoder_hidden, v, W):
    # Pure-JAX reference mirroring the PyTorch forward (concat form).
    B, H, S = static_hidden.shape
    hidden = jnp.concatenate(
        [static_hidden, jnp.broadcast_to(decoder_hidden[:, :, None], (B, H, S))], axis=1)
    Wb = jnp.broadcast_to(W, (B, H, 2 * H))
    vb = jnp.broadcast_to(v, (B, 1, H))
    attns = jnp.einsum("bih,bhs->bis", vb, jnp.tanh(jnp.einsum("bhj,bjs->bhs", Wb, hidden)))
    return jax.nn.softmax(attns, axis=2)


if __name__ == "__main__":
    B, H, S = 24, 32, 8   # 24 batches with TB=8 -> grid of 3 steps

    key = jax.random.PRNGKey(0)
    k1, k2, k3, k4 = jax.random.split(key, 4)

    static_hidden = jax.random.normal(k1, (B, H, S), dtype=jnp.float32)
    decoder_hidden = jax.random.normal(k2, (B, H), dtype=jnp.float32)

    # Parameter shapes from Attention.__init__ (zeros there; use small random values
    # so the softmax is non-trivial).
    v_param = 0.1 * jax.random.normal(k3, (1, 1, H), dtype=jnp.float32)
    W_param = 0.1 * jax.random.normal(k4, (1, H, 2 * H), dtype=jnp.float32)

    out = attention_forward(static_hidden, decoder_hidden, v_param, W_param)
    out = jax.block_until_ready(out)

    ref = attention_reference(static_hidden, decoder_hidden, v_param, W_param)
    assert out.shape == (B, 1, S)
    assert jnp.allclose(out, ref, atol=1e-5, rtol=1e-5), "mismatch vs reference"
    assert jnp.allclose(jnp.sum(out, axis=2), 1.0, atol=1e-5), "softmax rows must sum to 1"

    print("KERNEL_OK")
</pallas_src>

<mosaic_0001>
module attributes {stable_mosaic.version = 11 : i64} {
  func.func @attention_kernel(%arg0: i32, %arg1: memref<8x32x8xf32, #tpu.memory_space<vmem>>, %arg2: memref<8x32x1xf32, #tpu.memory_space<vmem>>, %arg3: memref<1x32xf32, #tpu.memory_space<vmem>>, %arg4: memref<32x32xf32, #tpu.memory_space<vmem>>, %arg5: memref<32x32xf32, #tpu.memory_space<vmem>>, %arg6: memref<8x1x8xf32, #tpu.memory_space<vmem>>) attributes {dimension_semantics = [#tpu.dimension_semantics<parallel>], iteration_bounds = array<i64: 3>, scalar_prefetch = 0 : i64, scratch_operands = 0 : i64, tpu.core_type = #tpu.core_type<tc>, window_params = [{transform_indices = @transform_0, window_bounds = array<i64: 8, 32, 8>}, {transform_indices = @transform_1, window_bounds = array<i64: 8, 32, 1>}, {pipeline_mode = #tpu.pipeline_mode<synchronous>, transform_indices = @transform_2, window_bounds = array<i64: 1, 32>}, {pipeline_mode = #tpu.pipeline_mode<synchronous>, transform_indices = @transform_3, window_bounds = array<i64: 32, 32>}, {pipeline_mode = #tpu.pipeline_mode<synchronous>, transform_indices = @transform_4, window_bounds = array<i64: 32, 32>}, {transform_indices = @transform_5, window_bounds = array<i64: 8, 1, 8>}]} {
    %c0 = arith.constant 0 : index
    %c0_0 = arith.constant 0 : index
    %c0_1 = arith.constant 0 : index
    %0 = vector.load %arg1[%c0, %c0_0, %c0_1] : memref<8x32x8xf32, #tpu.memory_space<vmem>>, vector<8x32x8xf32>
    %c0_2 = arith.constant 0 : index
    %c0_3 = arith.constant 0 : index
    %c0_4 = arith.constant 0 : index
    %1 = vector.load %arg2[%c0_2, %c0_3, %c0_4] : memref<8x32x1xf32, #tpu.memory_space<vmem>>, vector<8x32x1xf32>
    %c0_5 = arith.constant 0 : index
    %c0_6 = arith.constant 0 : index
    %2 = vector.load %arg3[%c0_5, %c0_6] : memref<1x32xf32, #tpu.memory_space<vmem>>, vector<1x32xf32>
    %c0_7 = arith.constant 0 : index
    %c0_8 = arith.constant 0 : index
    %3 = vector.load %arg4[%c0_7, %c0_8] : memref<32x32xf32, #tpu.memory_space<vmem>>, vector<32x32xf32>
    %c0_9 = arith.constant 0 : index
    %c0_10 = arith.constant 0 : index
    %4 = vector.load %arg5[%c0_9, %c0_10] : memref<32x32xf32, #tpu.memory_space<vmem>>, vector<32x32xf32>
    %5 = vector.shape_cast %3 : vector<32x32xf32> to vector<1x32x32xf32>
    %6 = vector.broadcast %5 : vector<1x32x32xf32> to vector<8x32x32xf32>
    %cst = arith.constant dense<0.000000e+00> : vector<8x32x8xf32>
    %7 = tpu.matmul %6, %0, %cst {dimension_numbers = #tpu.dot_dimension_numbers<[2], [1], [1], [2], [0, 0, 0, 1, 1, 2], [0], [0]>} : vector<8x32x32xf32>, vector<8x32x8xf32>, vector<8x32x8xf32> -> vector<8x32x8xf32>
    %8 = vector.shape_cast %4 : vector<32x32xf32> to vector<1x32x32xf32>
    %9 = vector.broadcast %8 : vector<1x32x32xf32> to vector<8x32x32xf32>
    %cst_11 = arith.constant dense<0.000000e+00> : vector<8x32x1xf32>
    %10 = tpu.matmul %9, %1, %cst_11 {dimension_numbers = #tpu.dot_dimension_numbers<[2], [1], [1], [2], [0, 0, 0, 1, 1, 2], [0], [0]>} : vector<8x32x32xf32>, vector<8x32x1xf32>, vector<8x32x1xf32> -> vector<8x32x1xf32>
    %11 = vector.broadcast %10 : vector<8x32x1xf32> to vector<8x32x8xf32>
    %12 = arith.addf %7, %11 : vector<8x32x8xf32>
    %13 = math.tanh %12 : vector<8x32x8xf32>
    %14 = vector.shape_cast %2 : vector<1x32xf32> to vector<1x1x32xf32>
    %15 = vector.broadcast %14 : vector<1x1x32xf32> to vector<8x1x32xf32>
    %cst_12 = arith.constant dense<0.000000e+00> : vector<8x1x8xf32>
    %16 = tpu.matmul %15, %13, %cst_12 {dimension_numbers = #tpu.dot_dimension_numbers<[2], [1], [1], [2], [0, 0, 0, 1, 1, 2], [0], [0]>} : vector<8x1x32xf32>, vector<8x32x8xf32>, vector<8x1x8xf32> -> vector<8x1x8xf32>
    %cst_13 = arith.constant dense<0xFF800000> : vector<8x1xf32>
    %17 = vector.multi_reduction <maximumf>, %16, %cst_13 [2] : vector<8x1x8xf32> to vector<8x1xf32>
    %18 = vector.shape_cast %17 : vector<8x1xf32> to vector<8x1x1xf32>
    %19 = vector.broadcast %18 : vector<8x1x1xf32> to vector<8x1x8xf32>
    %20 = arith.subf %16, %19 : vector<8x1x8xf32>
    %21 = math.exp %20 : vector<8x1x8xf32>
    %cst_14 = arith.constant dense<0.000000e+00> : vector<8x1xf32>
    %22 = vector.multi_reduction <add>, %21, %cst_14 [2] : vector<8x1x8xf32> to vector<8x1xf32>
    %23 = vector.shape_cast %22 : vector<8x1xf32> to vector<8x1x1xf32>
    %24 = vector.broadcast %23 : vector<8x1x1xf32> to vector<8x1x8xf32>
    %25 = arith.divf %21, %24 : vector<8x1x8xf32>
    %c0_15 = arith.constant 0 : index
    %c0_16 = arith.constant 0 : index
    %c0_17 = arith.constant 0 : index
    %26 = vector.load %arg6[%c0_15, %c0_16, %c0_17] : memref<8x1x8xf32, #tpu.memory_space<vmem>>, vector<8x1x8xf32>
    tpu.vector_store %arg6[%c0_15, %c0_16, %c0_17], %25 {strides = array<i32>} : memref<8x1x8xf32, #tpu.memory_space<vmem>>, vector<8x1x8xf32>,
    return
  }
  func.func @transform_0(%arg0: i32) -> (i32, i32, i32) {
    %c0_i32 = arith.constant 0 : i32
    %c0_i32_0 = arith.constant 0 : i32
    %c0_i32_1 = arith.constant 0 : i32
    return %arg0, %c0_i32, %c0_i32_0 : i32, i32, i32
  }
  func.func @transform_1(%arg0: i32) -> (i32, i32, i32) {
    %c0_i32 = arith.constant 0 : i32
    %c0_i32_0 = arith.constant 0 : i32
    %c0_i32_1 = arith.constant 0 : i32
    return %arg0, %c0_i32, %c0_i32_0 : i32, i32, i32
  }
  func.func @transform_2(%arg0: i32) -> (i32, i32) {
    %c0_i32 = arith.constant 0 : i32
    %c0_i32_0 = arith.constant 0 : i32
    %c0_i32_1 = arith.constant 0 : i32
    return %c0_i32, %c0_i32_0 : i32, i32
  }
  func.func @transform_3(%arg0: i32) -> (i32, i32) {
    %c0_i32 = arith.constant 0 : i32
    %c0_i32_0 = arith.constant 0 : i32
    %c0_i32_1 = arith.constant 0 : i32
    return %c0_i32, %c0_i32_0 : i32, i32
  }
  func.func @transform_4(%arg0: i32) -> (i32, i32) {
    %c0_i32 = arith.constant 0 : i32
    %c0_i32_0 = arith.constant 0 : i32
    %c0_i32_1 = arith.constant 0 : i32
    return %c0_i32, %c0_i32_0 : i32, i32
  }
  func.func @transform_5(%arg0: i32) -> (i32, i32, i32) {
    %c0_i32 = arith.constant 0 : i32
    %c0_i32_0 = arith.constant 0 : i32
    %c0_i32_1 = arith.constant 0 : i32
    return %arg0, %c0_i32, %c0_i32_0 : i32, i32, i32
  }
}

</mosaic_0001>

<bundles_post_ra>
// kernel: tpu_custom_call.1
= control target key start
LH: loop header
LB: loop body
LE: loop exit
PB: predicated region body
PF: predicated region fallthrough
CT: control target
= control target key end

     0   :  { %s3522_s18 = smov 0   ;;  %s3942_s0 = inlined_call_operand.vmem [shape: f32[24,32,8], index: 0, kind: input, shape index: {}]   ;;  %s3943_s1 = inlined_call_operand.vmem [shape: f32[24,32,1], index: 1, kind: input, shape index: {}]   ;;  %s3944_s2 = inlined_call_operand.vmem [shape: f32[1,32], index: 2, kind: input, shape index: {}]   ;;  %s3945_s3 = inlined_call_operand.vmem [shape: f32[32,32], index: 3, kind: input, shape index: {}]   ;;  %s3946_s4 = inlined_call_operand.vmem [shape: f32[32,32], index: 4, kind: input, shape index: {}]   ;;  %s3947_s5 = inlined_call_operand.vmem [shape: f32[24,1,8], index: 5, kind: output, shape index: {}]  }
   0x1 LB: > { %s2626_s19 = sadd.s32 4294967295, %s3486_s18   ;;  %p2630_p0 = scmp.ge.s32.totalorder %s3486_s18, 1  ;;  %s3486_s18 = sphi %s3522_s18, %s15_s18  }
   0x2   : > { %p201_p1 = scmp.lt.s32.totalorder %s3486_s18, 4 }
   0x4   : > { %p202_p2 = pnand %p2630_p0, %p201_p1 }
   0x5   : > { %s2631_s20 = sshll.u32 (!%p202_p2), %s2626_s19, 3  ;;  %v3533_v0 = vld [vmem:[%s3946_s4] sm:$0xff] (!%p202_p2)  ;;  %vm327_vm0 = vcmask (!%p202_p2), 261120   ;;  %v3488_v1 = vmov (!%p202_p2), 0   ;;  %v3566_v22 = vld [vmem:[%s3946_s4 + $0x8] sm:$0xff] (!%p202_p2)  ;;  %v3573_v25 = vld [vmem:[%s3946_s4 + $0x10] sm:$0xff] (!%p202_p2) }
   0x6   : > { %205 = sbr.rel (%p202_p2) target bundleno = 973 (0x3cd), region = 40  ;;  %p236_p3 = scmp.lt.s32.totalorder (!%p202_p2), %s2631_s20, 23  ;;  %2890 = vmatprep.mubr.msk.f32.mxu0 (!%p202_p2), %vm327_vm0, %v3533_v0  ;;  %2904 = vmatprep.mubr.msk.f32.mxu1 (!%p202_p2), %vm327_vm0, %v3533_v0  ;;  %v3586_v30 = vld [vmem:[%s3946_s4 + $0x18] sm:$0xff] (!%p202_p2)  ;;  %vm3490_vm1 = vmmov (!%p202_p2), 0   ;;  %vm2467_vm2 = vcmask (!%p202_p2), 57344  }
   0x7   : > { %3383 = vset.pattern.permute.xlu1 (!%p202_p2), %v3488_v1  ;;  %3382 = vset.pattern.permute.xlu0 (!%p202_p2), %v3488_v1 }
   0xd   : > { %s3949_s20 = smov (!%p236_p3, %s2631_s20), 23 }
   0xe   : > { %s2712_s23 = sshll.u32 %s3949_s20, 5  ;;  %s3921_s25 = scalar_lea.vmem %s3947_s5, %s3949_s20 }
   0xf   : > { %s3547_s26 = scalar_lea.vmem %s3943_s1, %s2712_s23  ;;  %s3629_s10 = scalar_lea.vmem %s3942_s0, %s2712_s23 }
  0x10   : > { %v286_v2 = vld [vmem:[%s3547_s26] sm:$0xff]  ;;  %v287_v3 = vld [vmem:[%s3547_s26 + $0x8] sm:$0xff]  ;;  %v288_v7 = vld [vmem:[%s3547_s26 + $0x10] sm:$0xff] }
  0x11   : > { %v290_v4 = vld [vmem:[%s3547_s26 + $0x20] sm:$0xff]  ;;  %v3194_v5 = vpack.c.bf16 %v287_v3, %v286_v2  ;;  %v291_v6 = vld [vmem:[%s3547_s26 + $0x28] sm:$0xff]  ;;  %v289_v8 = vld [vmem:[%s3547_s26 + $0x18] sm:$0xff] }
  0x12   : > { %v3202_v9 = vpack.c.bf16 %v291_v6, %v290_v4  ;;  %v3198_v10 = vpack.c.bf16 %v289_v8, %v288_v7  ;;  %v292_v11 = vld [vmem:[%s3547_s26 + $0x30] sm:$0xff]  ;;  %v293_v12 = vld [vmem:[%s3547_s26 + $0x38] sm:$0xff]  ;;  %v294_v13 = vld [vmem:[%s3547_s26 + $0x40] sm:$0xff] }
  0x13   : > { %3195 = vmatprep.subr.bf16.mxu0 %v3194_v5  ;;  %v3206_v14 = vpack.c.bf16 %v293_v12, %v292_v11  ;;  %v295_v15 = vld [vmem:[%s3547_s26 + $0x48] sm:$0xff]  ;;  %v298_v16 = vld [vmem:[%s3547_s26 + $0x60] sm:$0xff]  ;;  %v296_v20 = vld [vmem:[%s3547_s26 + $0x50] sm:$0xff] }
  0x14   : > { %3203 = vmatprep.subr.bf16.mxu1 %v3202_v9  ;;  %3197 = vmatpush3.bf16.msra.mxu0 %v3194_v5  ;;  %v299_v17 = vld [vmem:[%s3547_s26 + $0x68] sm:$0xff]  ;;  %v3210_v18 = vpack.c.bf16 %v295_v15, %v294_v13  ;;  %v297_v21 = vld [vmem:[%s3547_s26 + $0x58] sm:$0xff]  ;;  %v300_v23 = vld [vmem:[%s3547_s26 + $0x70] sm:$0xff] }
  0x15   : > { %3205 = vmatpush3.bf16.msra.mxu1 %v3202_v9  ;;  %3199 = vmatprep.subr.bf16.mxu0 %v3198_v10  ;;  %v3218_v19 = vpack.c.bf16 %v299_v17, %v298_v16  ;;  %v301_v24 = vld [vmem:[%s3547_s26 + $0x78] sm:$0xff]  ;;  %v3214_v26 = vpack.c.bf16 %v297_v21, %v296_v20  ;;  %v302_v28 = vld [vmem:[%s3547_s26 + $0x80] sm:$0xff]  ;;  %v303_v29 = vld [vmem:[%s3547_s26 + $0x88] sm:$0xff] }
  0x16   : > { %3207 = vmatprep.subr.bf16.mxu1 %v3206_v14  ;;  %v3222_v27 = vpack.c.bf16 %v301_v24, %v300_v23  ;;  %v306_v31 = vld [vmem:[%s3547_s26 + $0xa0] sm:$0xff]  ;;  %v307_v32 = vld [vmem:[%s3547_s26 + $0xa8] sm:$0xff]  ;;  %v3226_v33 = vpack.c.bf16 %v303_v29, %v302_v28  ;;  %v304_v35 = vld [vmem:[%s3547_s26 + $0x90] sm:$0xff] }
  0x17   : > { %v3234_v34 = vpack.c.bf16 %v307_v32, %v306_v31  ;;  %v305_v36 = vld [vmem:[%s3547_s26 + $0x98] sm:$0xff]  ;;  %v308_v37 = vld [vmem:[%s3547_s26 + $0xb0] sm:$0xff]  ;;  %v310_v41 = vld [vmem:[%s3547_s26 + $0xc0] sm:$0xff] }
  0x18   : > { %3201 = vmatpush3.bf16.msra.mxu0 %v3198_v10  ;;  %v309_v38 = vld [vmem:[%s3547_s26 + $0xb8] sm:$0xff]  ;;  %v3230_v39 = vpack.c.bf16 %v305_v36, %v304_v35  ;;  %v311_v42 = vld [vmem:[%s3547_s26 + $0xc8] sm:$0xff]  ;;  %v314_v43 = vld [vmem:[%s3547_s26 + $0xe0] sm:$0xff] }
  0x19   : > { %3209 = vmatpush3.bf16.msra.mxu1 %v3206_v14  ;;  %3211 = vmatprep.subr.bf16.mxu0 %v3210_v18  ;;  %v3238_v40 = vpack.c.bf16 %v309_v38, %v308_v37  ;;  %v315_v44 = vld [vmem:[%s3547_s26 + $0xe8] sm:$0xff]  ;;  %v3242_v45 = vpack.c.bf16 %v311_v42, %v310_v41  ;;  %v312_v47 = vld [vmem:[%s3547_s26 + $0xd0] sm:$0xff]  ;;  %v313_v48 = vld [vmem:[%s3547_s26 + $0xd8] sm:$0xff] }
  0x1a   : > { %3219 = vmatprep.subr.bf16.mxu1 %v3218_v19  ;;  %v3250_v46 = vpack.c.bf16 %v315_v44, %v314_v43  ;;  %v316_v49 = vld [vmem:[%s3547_s26 + $0xf0] sm:$0xff]  ;;  %v317_v50 = vld [vmem:[%s3547_s26 + $0xf8] sm:$0xff]  ;;  %v3246_v51 = vpack.c.bf16 %v313_v48, %v312_v47  ;;  %v254_v53 = vld [vmem:[%s3629_s10] sm:$0xff] }
  0x1b   : > { %2891 = vmatmul.mubr.msk.f32.vlgmr.msra.gmra.mrb[0].mxu0 %vm327_vm0, %v3566_v22  ;;  %v3254_v52 = vpack.c.bf16 %v317_v50, %v316_v49  ;;  %v255_v54 = vld [vmem:[%s3629_s10 + $0x8] sm:$0xff]  ;;  %v258_v55 = vld [vmem:[%s3629_s10 + $0x20] sm:$0xff]  ;;  %v256_v59 = vld [vmem:[%s3629_s10 + $0x10] sm:$0xff] }
  0x1c   : > { %2905 = vmatmul.mubr.msk.f32.vlgmr.msra.gmra.mrb[0].mxu1 %vm327_vm0, %v3566_v22  ;;  %2893 = vmatprep.mubr.msk.f32.mxu0 %vm327_vm0, %v3573_v25  ;;  %v259_v56 = vld [vmem:[%s3629_s10 + $0x28] sm:$0xff]  ;;  %v3258_v57 = vpack.c.bf16 %v255_v54, %v254_v53  ;;  %v257_v60 = vld [vmem:[%s3629_s10 + $0x18] sm:$0xff]  ;;  %v260_v61 = vld [vmem:[%s3629_s10 + $0x30] sm:$0xff] }
  0x1d   : > { %3213 = vmatpush3.bf16.msra.mxu0 %v3210_v18  ;;  %2907 = vmatprep.mubr.msk.f32.mxu1 %vm327_vm0, %v3573_v25  ;;  %v3266_v58 = vpack.c.bf16 %v259_v56, %v258_v55  ;;  %v261_v62 = vld [vmem:[%s3629_s10 + $0x38] sm:$0xff]  ;;  %v3262_v63 = vpack.c.bf16 %v257_v60, %v256_v59  ;;  %v262_v2 = vld [vmem:[%s3629_s10 + $0x40] sm:$0xff]  ;;  %v263_v3 = vld [vmem:[%s3629_s10 + $0x48] sm:$0xff] }
  0x1e   : > { %3215 = vmatprep.subr.bf16.mxu0 %v3214_v26  ;;  %3221 = vmatpush3.bf16.msra.mxu1 %v3218_v19  ;;  %v3270_v1 = vpack.c.bf16 %v261_v62, %v260_v61  ;;  %v267_v4 = vld [vmem:[%s3629_s10 + $0x68] sm:$0xff]  ;;  %v3674_v5 = vld [vmem:[%s3945_s3] sm:$0xff]  ;;  %v3274_v6 = vpack.c.bf16 %v263_v3, %v262_v2  ;;  %v264_v8 = vld [vmem:[%s3629_s10 + $0x50] sm:$0xff]  ;;  %v3489_v61 = vmov 0.0|0.0  }
  0x1f   : > { %2894 = vmatmul.mubr.msk.f32.gmra.mrb[2].mxu0 %vm327_vm0, %v3586_v30  ;;  %3223 = vmatprep.subr.bf16.mxu1 %v3222_v27  ;;  %v265_v9 = vld [vmem:[%s3629_s10 + $0x58] sm:$0xff]  ;;  %v3689_v10 = vld [vmem:[%s3945_s3 + $0x8] sm:$0xff]  ;;  %v268_v11 = vld [vmem:[%s3629_s10 + $0x70] sm:$0xff] }
  0x20   : > { %2908 = vmatmul.mubr.msk.f32.gmra.mrb[2].mxu1 %vm327_vm0, %v3586_v30  ;;  %2918 = vmatprep.mubr.msk.f32.mxu0 %vm327_vm0, %v3533_v0  ;;  %v269_v12 = vld [vmem:[%s3629_s10 + $0x78] sm:$0xff]  ;;  %v3696_v13 = vld [vmem:[%s3945_s3 + $0x10] sm:$0xff]  ;;  %v3278_v14 = vpack.c.bf16 %v265_v9, %v264_v8  ;;  %v270_v16 = vld [vmem:[%s3629_s10 + $0x80] sm:$0xff] }
  0x21   : > { %3217 = vmatpush3.bf16.msra.mxu0 %v3214_v26  ;;  %2932 = vmatprep.mubr.msk.f32.mxu1 %vm327_vm0, %v3533_v0  ;;  %v3286_v15 = vpack.c.bf16 %v269_v12, %v268_v11  ;;  %v271_v17 = vld [vmem:[%s3629_s10 + $0x88] sm:$0xff]  ;;  %v3709_v18 = vld [vmem:[%s3945_s3 + $0x18] sm:$0xff]  ;;  %v274_v19 = vld [vmem:[%s3629_s10 + $0xa0] sm:$0xff] }
  0x22   : > { %3225 = vmatpush3.bf16.msra.mxu1 %v3222_v27  ;;  %3227 = vmatprep.subr.bf16.mxu0 %v3226_v33  ;;  %v275_v20 = vld [vmem:[%s3629_s10 + $0xa8] sm:$0xff]  ;;  %v3290_v21 = vpack.c.bf16 %v271_v17, %v270_v16  ;;  %v272_v23 = vld [vmem:[%s3629_s10 + $0x90] sm:$0xff]  ;;  %v273_v24 = vld [vmem:[%s3629_s10 + $0x98] sm:$0xff] }
  0x23   : > { %3235 = vmatprep.subr.bf16.mxu1 %v3234_v34  ;;  %v277_v26 = vld [vmem:[%s3629_s10 + $0xb8] sm:$0xff]  ;;  %v3294_v27 = vpack.c.bf16 %v273_v24, %v272_v23  ;;  %v278_v29 = vld [vmem:[%s3629_s10 + $0xc0] sm:$0xff]  ;;  %v283_v32 = vld [vmem:[%s3629_s10 + $0xe8] sm:$0xff] }
  0x24   : > { %2919 = vmatmul.mubr.msk.f32.vlgmr.msra.gmra.mrb[4].mxu0 %vm327_vm0, %v3566_v22  ;;  %v282_v31 = vld [vmem:[%s3629_s10 + $0xe0] sm:$0xff]  ;;  %v280_v35 = vld [vmem:[%s3629_s10 + $0xd0] sm:$0xff]  ;;  %v281_v36 = vld [vmem:[%s3629_s10 + $0xd8] sm:$0xff] }
  0x25   : > { %2933 = vmatmul.mubr.msk.f32.vlgmr.msra.gmra.mrb[4].mxu1 %vm327_vm0, %v3566_v22  ;;  %2921 = vmatprep.mubr.msk.f32.mxu0 %vm327_vm0, %v3573_v25  ;;  %v284_v37 = vld [vmem:[%s3629_s10 + $0xf0] sm:$0xff]  ;;  %v285_v38 = vld [vmem:[%s3629_s10 + $0xf8] sm:$0xff] }
  0x26   : > { %3229 = vmatpush3.bf16.msra.mxu0 %v3226_v33  ;;  %2935 = vmatprep.mubr.msk.f32.mxu1 %vm327_vm0, %v3573_v25 }
  0x27   : > { %3231 = vmatprep.subr.bf16.mxu0 %v3230_v39  ;;  %3237 = vmatpush3.bf16.msra.mxu1 %v3234_v34  ;;  %v3314_v34 = vpack.c.bf16 %v283_v32, %v282_v31 }
  0x28   : > { %2922 = vmatmul.mubr.msk.f32.gmra.mrb[6].mxu0 %vm327_vm0, %v3586_v30  ;;  %3239 = vmatprep.subr.bf16.mxu1 %v3238_v40 }
  0x29   : > { %2936 = vmatmul.mubr.msk.f32.gmra.mrb[6].mxu1 %vm327_vm0, %v3586_v30  ;;  %2946 = vmatprep.mubr.msk.f32.mxu0 %vm327_vm0, %v3533_v0 }
  0x2a   : > { %3233 = vmatpush3.bf16.msra.mxu0 %v3230_v39  ;;  %2960 = vmatprep.mubr.msk.f32.mxu1 %vm327_vm0, %v3533_v0  ;;  %v3310_v39 = vpack.c.bf16 %v281_v36, %v280_v35 }
  0x2b   : > { %3241 = vmatpush3.bf16.msra.mxu1 %v3238_v40  ;;  %3243 = vmatprep.subr.bf16.mxu0 %v3242_v45  ;;  %v3318_v40 = vpack.c.bf16 %v285_v38, %v284_v37 }
  0x2c   : > { %3251 = vmatprep.subr.bf16.mxu1 %v3250_v46 }
  0x2d   : > { %2947 = vmatmul.mubr.msk.f32.vlgmr.msra.gmra.mrb[8].mxu0 %vm327_vm0, %v3566_v22 }
  0x2e   : > { %2961 = vmatmul.mubr.msk.f32.vlgmr.msra.gmra.mrb[8].mxu1 %vm327_vm0, %v3566_v22  ;;  %2949 = vmatprep.mubr.msk.f32.mxu0 %vm327_vm0, %v3573_v25 }
  0x2f   : > { %3245 = vmatpush3.bf16.msra.mxu0 %v3242_v45  ;;  %2963 = vmatprep.mubr.msk.f32.mxu1 %vm327_vm0, %v3573_v25 }
  0x30   : > { %3247 = vmatprep.subr.bf16.mxu0 %v3246_v51  ;;  %3253 = vmatpush3.bf16.msra.mxu1 %v3250_v46 }
  0x31   : > { %2950 = vmatmul.mubr.msk.f32.gmra.mrb[10].mxu0 %vm327_vm0, %v3586_v30  ;;  %3255 = vmatprep.subr.bf16.mxu1 %v3254_v52 }
  0x32   : > { %2964 = vmatmul.mubr.msk.f32.gmra.mrb[10].mxu1 %vm327_vm0, %v3586_v30  ;;  %2974 = vmatprep.mubr.msk.f32.mxu0 %vm327_vm0, %v3533_v0 }
  0x33   : > { %3249 = vmatpush3.bf16.msra.mxu0 %v3246_v51  ;;  %2988 = vmatprep.mubr.msk.f32.mxu1 %vm327_vm0, %v3533_v0  ;;  %v266_v0 = vld [vmem:[%s3629_s10 + $0x60] sm:$0xff] }
  0x34   : > { %3257 = vmatpush3.bf16.msra.mxu1 %v3254_v52  ;;  %3259 = vmatprep.subr.bf16.mxu0 %v3258_v57  ;;  %v3282_v7 = vpack.c.bf16 %v267_v4, %v266_v0  ;;  %v3491_v0 = vmov 0.0  }
  0x35   : > { %3267 = vmatprep.subr.bf16.mxu1 %v3266_v58 }
  0x36   : > { %2975 = vmatmul.mubr.msk.f32.vlgmr.msra.gmra.mrb[12].mxu0 %vm327_vm0, %v3566_v22 }
  0x37   : > { %2989 = vmatmul.mubr.msk.f32.vlgmr.msra.gmra.mrb[12].mxu1 %vm327_vm0, %v3566_v22  ;;  %2977 = vmatprep.mubr.msk.f32.mxu0 %vm327_vm0, %v3573_v25  ;;  %v3298_v22 = vpack.c.bf16 %v275_v20, %v274_v19 }
  0x38   : > { %2991 = vmatprep.mubr.msk.f32.mxu1 %vm327_vm0, %v3573_v25  ;;  %3261 = vmatpush3.bf16.msra.mxu0 %v3258_v57  ;;  %v276_v25 = vld [vmem:[%s3629_s10 + $0xb0] sm:$0xff] }
  0x39   : > { %3269 = vmatpush3.bf16.msra.mxu1 %v3266_v58  ;;  %3263 = vmatprep.subr.bf16.mxu0 %v3262_v63  ;;  %v3302_v28 = vpack.c.bf16 %v277_v26, %v276_v25 }
  0x3a   : > { %2978 = vmatmul.mubr.msk.f32.gmra.mrb[14].mxu0 %vm327_vm0, %v3586_v30  ;;  %3271 = vmatprep.subr.bf16.mxu1 %v3270_v1 }
  0x3b   : > { %2992 = vmatmul.mubr.msk.f32.gmra.mrb[14].mxu1 %vm327_vm0, %v3586_v30  ;;  %3002 = vmatprep.mubr.msk.f32.mxu0 %vm327_vm0, %v3674_v5  ;;  %v279_v30 = vld [vmem:[%s3629_s10 + $0xc8] sm:$0xff] }
  0x3c   : > { %3265 = vmatpush3.bf16.msra.mxu0 %v3262_v63  ;;  %3016 = vmatprep.mubr.msk.f32.mxu1 %vm327_vm0, %v3674_v5  ;;  %v3306_v33 = vpack.c.bf16 %v279_v30, %v278_v29 }
  0x3d   : > { %3273 = vmatpush3.bf16.msra.mxu1 %v3270_v1  ;;  %3275 = vmatprep.subr.bf16.mxu0 %v3274_v6 }
  0x3e   : > { %3283 = vmatprep.subr.bf16.mxu1 %v3282_v7 }
  0x3f   : > { %3003 = vmatmul.mubr.msk.f32.vlgmr.msra.gmra.mrb[16].mxu0 %vm327_vm0, %v3689_v10 }
  0x40   : > { %3017 = vmatmul.mubr.msk.f32.vlgmr.msra.gmra.mrb[16].mxu1 %vm327_vm0, %v3689_v10  ;;  %3005 = vmatprep.mubr.msk.f32.mxu0 %vm327_vm0, %v3696_v13 }
  0x41   : > { %3277 = vmatpush3.bf16.msra.mxu0 %v3274_v6  ;;  %3019 = vmatprep.mubr.msk.f32.mxu1 %vm327_vm0, %v3696_v13 }
  0x42   : > { %3279 = vmatprep.subr.bf16.mxu0 %v3278_v14  ;;  %3285 = vmatpush3.bf16.msra.mxu1 %v3282_v7 }
  0x43   : > { %3006 = vmatmul.mubr.msk.f32.gmra.mrb[18].mxu0 %vm327_vm0, %v3709_v18  ;;  %3287 = vmatprep.subr.bf16.mxu1 %v3286_v15 }
  0x44   : > { %3020 = vmatmul.mubr.msk.f32.gmra.mrb[18].mxu1 %vm327_vm0, %v3709_v18  ;;  %3030 = vmatprep.mubr.msk.f32.mxu0 %vm327_vm0, %v3674_v5 }
  0x45   : > { %3281 = vmatpush3.bf16.msra.mxu0 %v3278_v14  ;;  %3044 = vmatprep.mubr.msk.f32.mxu1 %vm327_vm0, %v3674_v5 }
  0x46   : > { %3289 = vmatpush3.bf16.msra.mxu1 %v3286_v15  ;;  %3291 = vmatprep.subr.bf16.mxu0 %v3290_v21 }
  0x47   : > { %3299 = vmatprep.subr.bf16.mxu1 %v3298_v22 }
  0x48   : > { %3031 = vmatmul.mubr.msk.f32.vlgmr.msra.gmra.mrb[20].mxu0 %vm327_vm0, %v3689_v10 }
  0x49   : > { %3045 = vmatmul.mubr.msk.f32.vlgmr.msra.gmra.mrb[20].mxu1 %vm327_vm0, %v3689_v10  ;;  %3033 = vmatprep.mubr.msk.f32.mxu0 %vm327_vm0, %v3696_v13 }
  0x4a   : > { %3293 = vmatpush3.bf16.msra.mxu0 %v3290_v21  ;;  %3047 = vmatprep.mubr.msk.f32.mxu1 %vm327_vm0, %v3696_v13 }
  0x4b   : > { %3295 = vmatprep.subr.bf16.mxu0 %v3294_v27  ;;  %3301 = vmatpush3.bf16.msra.mxu1 %v3298_v22 }
  0x4c   : > { %3034 = vmatmul.mubr.msk.f32.gmra.mrb[22].mxu0 %vm327_vm0, %v3709_v18  ;;  %3303 = vmatprep.subr.bf16.mxu1 %v3302_v28 }
  0x4d   : > { %3048 = vmatmul.mubr.msk.f32.gmra.mrb[22].mxu1 %vm327_vm0, %v3709_v18  ;;  %3058 = vmatprep.mubr.msk.f32.mxu0 %vm327_vm0, %v3674_v5 }
  0x4e   : > { %3297 = vmatpush3.bf16.msra.mxu0 %v3294_v27  ;;  %3072 = vmatprep.mubr.msk.f32.mxu1 %vm327_vm0, %v3674_v5 }
  0x4f   : > { %3305 = vmatpush3.bf16.msra.mxu1 %v3302_v28  ;;  %3307 = vmatprep.subr.bf16.mxu0 %v3306_v33 }
  0x50   : > { %3315 = vmatprep.subr.bf16.mxu1 %v3314_v34 }
  0x51   : > { %3059 = vmatmul.mubr.msk.f32.vlgmr.msra.gmra.mrb[24].mxu0 %vm327_vm0, %v3689_v10 }
  0x52   : > { %3073 = vmatmul.mubr.msk.f32.vlgmr.msra.gmra.mrb[24].mxu1 %vm327_vm0, %v3689_v10  ;;  %3061 = vmatprep.mubr.msk.f32.mxu0 %vm327_vm0, %v3696_v13 }
  0x53   : > { %3309 = vmatpush3.bf16.msra.mxu0 %v3306_v33  ;;  %3075 = vmatprep.mubr.msk.f32.mxu1 %vm327_vm0, %v3696_v13 }
  0x54   : > { %3311 = vmatprep.subr.bf16.mxu0 %v3310_v39  ;;  %3317 = vmatpush3.bf16.msra.mxu1 %v3314_v34 }
  0x55   : > { %3062 = vmatmul.mubr.msk.f32.gmra.mrb[26].mxu0 %vm327_vm0, %v3709_v18  ;;  %3319 = vmatprep.subr.bf16.mxu1 %v3318_v40 }
  0x56   : > { %3076 = vmatmul.mubr.msk.f32.gmra.mrb[26].mxu1 %vm327_vm0, %v3709_v18  ;;  %3086 = vmatprep.mubr.msk.f32.mxu0 %vm327_vm0, %v3674_v5 }
  0x57   : > { %3313 = vmatpush3.bf16.msra.mxu0 %v3310_v39  ;;  %3100 = vmatprep.mubr.msk.f32.mxu1 %vm327_vm0, %v3674_v5 }
  0x58   : > { %3321 = vmatpush3.bf16.msra.mxu1 %v3318_v40  ;;  %3322 = vmatprep.subr.bf16.mxu0 %v3489_v61 }
  0x59   : > { %3328 = vmatprep.subr.bf16.mxu1 %v3489_v61 }
  0x5a   : > { %3087 = vmatmul.mubr.msk.f32.vlgmr.msra.gmra.mrb[28].mxu0 %vm327_vm0, %v3689_v10 }
  0x5b   : > { %3101 = vmatmul.mubr.msk.f32.vlgmr.msra.gmra.mrb[28].mxu1 %vm327_vm0, %v3689_v10  ;;  %3089 = vmatprep.mubr.msk.f32.mxu0 %vm327_vm0, %v3696_v13 }
  0x5c   : > { %3103 = vmatprep.mubr.msk.f32.mxu1 %vm327_vm0, %v3696_v13 }
  0x5e   : > { %3090 = vmatmul.mubr.msk.f32.gmra.mrb[30].mxu0 %vm327_vm0, %v3709_v18 }
  0x5f   : > { %3104 = vmatmul.mubr.msk.f32.gmra.mrb[30].mxu1 %vm327_vm0, %v3709_v18  ;;  %3114 = vmatprep.mubr.msk.f32.mxu0 %vm3490_vm1, %v3491_v0 }
  0x60   : > { %3125 = vmatprep.mubr.msk.f32.mxu1 %vm3490_vm1, %v3491_v0 }
  0xee   : > { %v2892_v41 = vpop.f32.mrb[0].mxu0 }
  0xef   : > { %v2906_v42 = vpop.f32.mrb[0].mxu1  ;;  %1027 = vperm.xlu0 %3382, %v2892_v41   ;;  %v406_v43 = vpop.f32.mrb[1].mxu0 }
  0xf0   : > { %1047 = vperm.xlu1 %3383, %v2906_v42   ;;  %v491_v44 = vpop.f32.mrb[1].mxu1 }
  0xf2   : > { %v2895_v45 = vpop.f32.mrb[2].mxu0 }
  0xf3   : > { %1022 = vperm.xlu0 %3382, %v406_v43   ;;  %v416_v46 = vpop.f32.mrb[3].mxu0  ;;  %v2909_v47 = vpop.f32.mrb[2].mxu1 }
  0xf4   : > { %1042 = vperm.xlu1 %3383, %v491_v44   ;;  %v501_v48 = vpop.f32.mrb[3].mxu1 }
  0xf7   : > { %1032 = vperm.xlu0 %3382, %v416_v46   ;;  %v2920_v49 = vpop.f32.mrb[4].mxu0 }
  0xf8   : > { %1037 = vperm.xlu1 %3383, %v2895_v45   ;;  %v576_v50 = vpop.f32.mrb[5].mxu0  ;;  %v2934_v51 = vpop.f32.mrb[4].mxu1 }
  0xf9   : > { %v661_v52 = vpop.f32.mrb[5].mxu1 }
  0xfb   : > { %1052 = vperm.xlu0 %3382, %v501_v48   ;;  %v2923_v53 = vpop.f32.mrb[6].mxu0 }
  0xfc   : > { %1057 = vperm.xlu1 %3383, %v2909_v47   ;;  %v586_v54 = vpop.f32.mrb[7].mxu0  ;;  %v2937_v55 = vpop.f32.mrb[6].mxu1 }
  0xfd   : > { %v671_v56 = vpop.f32.mrb[7].mxu1 }
  0xff   : > { %1062 = vperm.xlu0 %3382, %v576_v50  }
 0x100   : > { %1067 = vperm.xlu1 %3383, %v2920_v49   ;;  %v2948_v57 = vpop.f32.mrb[8].mxu0 }
 0x101   : > { %v746_v58 = vpop.f32.mrb[9].mxu0  ;;  %v2962_v59 = vpop.f32.mrb[8].mxu1 }
 0x102   : > { %v831_v60 = vpop.f32.mrb[9].mxu1 }
 0x103   : > { %1082 = vperm.xlu0 %3382, %v661_v52  }
 0x104   : > { %1087 = vperm.xlu1 %3383, %v2934_v51   ;;  %v2951_v62 = vpop.f32.mrb[10].mxu0 }
 0x105   : > { %v756_v63 = vpop.f32.mrb[11].mxu0  ;;  %v2965_v1 = vpop.f32.mrb[10].mxu1 }
 0x106   : > { %v841_v2 = vpop.f32.mrb[11].mxu1 }
 0x107   : > { %1072 = vperm.xlu0 %3382, %v586_v54  }
 0x108   : > { %1077 = vperm.xlu1 %3383, %v2923_v53  }
 0x109   : > { %v2976_v3 = vpop.f32.mrb[12].mxu0 }
 0x10a   : > { %v916_v4 = vpop.f32.mrb[13].mxu0  ;;  %v2990_v5 = vpop.f32.mrb[12].mxu1 }
 0x10b   : > { %1092 = vperm.xlu0 %3382, %v671_v56   ;;  %v1001_v6 = vpop.f32.mrb[13].mxu1 }
 0x10c   : > { %1097 = vperm.xlu1 %3383, %v2937_v55  }
 0x10d   : > { %v2979_v7 = vpop.f32.mrb[14].mxu0 }
 0x10e   : > { %v926_v8 = vpop.f32.mrb[15].mxu0  ;;  %v2993_v9 = vpop.f32.mrb[14].mxu1 }
 0x10f   : > { %1102 = vperm.xlu0 %3382, %v746_v58   ;;  %v1011_v10 = vpop.f32.mrb[15].mxu1 }
 0x110   : > { %1107 = vperm.xlu1 %3383, %v2948_v57  }
 0x112   : > { %v3004_v11 = vpop.f32.mrb[16].mxu0 }
 0x113   : > { %1122 = vperm.xlu0 %3382, %v831_v60   ;;  %v3018_v12 = vpop.f32.mrb[16].mxu1  ;;  %v1258_v13 = vpop.f32.mrb[17].mxu0 }
 0x114   : > { %1127 = vperm.xlu1 %3383, %v2962_v59   ;;  %v1343_v14 = vpop.f32.mrb[17].mxu1 }
 0x116   : > { %v3007_v15 = vpop.f32.mrb[18].mxu0 }
 0x117   : > { %1112 = vperm.xlu0 %3382, %v756_v63   ;;  %v1268_v16 = vpop.f32.mrb[19].mxu0  ;;  %v3021_v17 = vpop.f32.mrb[18].mxu1 }
 0x118   : > { %1117 = vperm.xlu1 %3383, %v2951_v62   ;;  %v1353_v18 = vpop.f32.mrb[19].mxu1 }
 0x11b   : > { %1132 = vperm.xlu0 %3382, %v841_v2   ;;  %v3785_v19 = vpop.f32.mrb[20].mxu0 }
 0x11c   : > { %1137 = vperm.xlu1 %3383, %v2965_v1   ;;  %v1428_v20 = vpop.f32.mrb[21].mxu0  ;;  %v3787_v21 = vpop.f32.mrb[20].mxu1 }
 0x11d   : > { %v3789_v22 = vpop.f32.mrb[21].mxu1 }
 0x11f   : > { %1142 = vperm.xlu0 %3382, %v916_v4   ;;  %v3791_v23 = vpop.f32.mrb[22].mxu0 }
 0x120   : > { %1147 = vperm.xlu1 %3383, %v2976_v3   ;;  %v3793_v24 = vpop.f32.mrb[23].mxu0  ;;  %v3795_v25 = vpop.f32.mrb[22].mxu1 }
 0x121   : > { %v3797_v26 = vpop.f32.mrb[23].mxu1 }
 0x123   : > { %1162 = vperm.xlu0 %3382, %v1001_v6  }
 0x124   : > { %1167 = vperm.xlu1 %3383, %v2990_v5   ;;  %v3799_v27 = vpop.f32.mrb[24].mxu0 }
 0x125   : > { %v3801_v28 = vpop.f32.mrb[25].mxu0  ;;  %v3803_v29 = vpop.f32.mrb[24].mxu1 }
 0x126   : > { %v3805_v30 = vpop.f32.mrb[25].mxu1 }
 0x127   : > { %1152 = vperm.xlu0 %3382, %v926_v8  }
 0x128   : > { %1157 = vperm.xlu1 %3383, %v2979_v7   ;;  %v3807_v31 = vpop.f32.mrb[26].mxu0 }
 0x129   : > { %v3809_v32 = vpop.f32.mrb[27].mxu0  ;;  %v3811_v33 = vpop.f32.mrb[26].mxu1 }
 0x12a   : > { %v3813_v34 = vpop.f32.mrb[27].mxu1 }
 0x12b   : > { %1172 = vperm.xlu0 %3382, %v1011_v10  }
 0x12c   : > { %1177 = vperm.xlu1 %3383, %v2993_v9  }
 0x12d   : > { %v3815_v35 = vpop.f32.mrb[28].mxu0 }
 0x12e   : > { %v3817_v36 = vpop.f32.mrb[29].mxu0  ;;  %v3819_v37 = vpop.f32.mrb[28].mxu1 }
 0x12f   : > { %v3821_v38 = vpop.f32.mrb[29].mxu1 }
 0x131   : > { %v3823_v39 = vpop.f32.mrb[30].mxu0 }
 0x132   : > { %v3825_v40 = vpop.f32.mrb[31].mxu0  ;;  %v3827_v41 = vpop.f32.mrb[30].mxu1 }
 0x133   : > { %v3829_v42 = vpop.f32.mrb[31].mxu1 }
 0x16e   : > { %v1028_v43 = vpop.permute.xlu0 %1027 }
 0x16f   : > { %v1048_v44 = vpop.permute.xlu1 %1047  ;;  %v1264_v45 = vadd.f32 %v3004_v11, %v1028_v43 }
 0x170   : > { %v1349_v46 = vadd.f32 %v3018_v12, %v1048_v44 }
 0x171   : > { %3384 = vtanh.f32 %v1264_v45 }
 0x172   : > { %v1023_v47 = vpop.permute.xlu0 %1022  ;;  %3386 = vtanh.f32 %v1349_v46 }
 0x173   : > { %v1043_v48 = vpop.permute.xlu1 %1042  ;;  %v1259_v49 = vadd.f32 %v1258_v13, %v1023_v47 }
 0x174   : > { %v1344_v50 = vadd.f32 %v1343_v14, %v1043_v48 }
 0x175   : > { %3388 = vtanh.f32 %v1259_v49 }
 0x176   : > { %3390 = vtanh.f32 %v1344_v50  ;;  %v1033_v51 = vpop.permute.xlu0 %1032 }
 0x177   : > { %v1038_v52 = vpop.permute.xlu1 %1037  ;;  %v1269_v53 = vadd.f32 %v1268_v16, %v1033_v51 }
 0x178   : > { %v1274_v54 = vadd.f32 %v3007_v15, %v1038_v52 }
 0x179   : > { %3392 = vtanh.f32 %v1269_v53 }
 0x17a   : > { %3394 = vtanh.f32 %v1274_v54  ;;  %v1053_v55 = vpop.permute.xlu0 %1052 }
 0x17b   : > { %v1058_v56 = vpop.permute.xlu1 %1057  ;;  %v1354_v57 = vadd.f32 %v1353_v18, %v1053_v55  ;;  %v3385_v59 = vpop.eup %3384  ;;  %v3840_v18 = vld [vmem:[%s3944_s2] sm:$0x1] }
 0x17c   : > { %v1359_v58 = vadd.f32 %v3021_v17, %v1058_v56  ;;  %v3387_v60 = vpop.eup %3386 }
 0x17d   : > { %3396 = vtanh.f32 %v1354_v57 }
 0x17e   : > { %3398 = vtanh.f32 %v1359_v58  ;;  %v1063_v62 = vpop.permute.xlu0 %1062 }
 0x17f   : > { %v3389_v63 = vpop.eup %3388  ;;  %v1068_v1 = vpop.permute.xlu1 %1067  ;;  %v1429_v2 = vadd.f32 %v1428_v20, %v1063_v62 }
 0x180   : > { %v3391_v3 = vpop.eup %3390  ;;  %v1434_v4 = vadd.f32 %v3785_v19, %v1068_v1  ;;  %v3323_v5 = vpack.c.bf16 %v3385_v59, %v3389_v63 }
 0x181   : > { %3400 = vtanh.f32 %v1429_v2  ;;  %v3329_v6 = vpack.c.bf16 %v3387_v60, %v3391_v3 }
 0x182   : > { %3402 = vtanh.f32 %v1434_v4  ;;  %v1083_v7 = vpop.permute.xlu0 %1082  ;;  %3324 = vmatpush3.bf16.msra.mxu0 %v3323_v5 }
 0x183   : > { %v3393_v8 = vpop.eup %3392  ;;  %v1088_v9 = vpop.permute.xlu1 %1087  ;;  %v1514_v10 = vadd.f32 %v3789_v22, %v1083_v7  ;;  %3330 = vmatpush3.bf16.msra.mxu1 %v3329_v6  ;;  %3325 = vmatprep.subr.bf16.mxu0 %v3489_v61 }
 0x184   : > { %v3395_v11 = vpop.eup %3394  ;;  %v1519_v12 = vadd.f32 %v3787_v21, %v1088_v9  ;;  %3331 = vmatprep.subr.bf16.mxu1 %v3489_v61 }
 0x185   : > { %3404 = vtanh.f32 %v1514_v10  ;;  %v3326_v13 = vpack.c.bf16 %v3395_v11, %v3393_v8 }
 0x186   : > { %3406 = vtanh.f32 %v1519_v12  ;;  %v1073_v14 = vpop.permute.xlu0 %1072 }
 0x187   : > { %v3397_v15 = vpop.eup %3396  ;;  %v1078_v16 = vpop.permute.xlu1 %1077  ;;  %v1439_v17 = vadd.f32 %v3793_v24, %v1073_v14  ;;  %3327 = vmatpush3.bf16.msra.mxu0 %v3326_v13 }
 0x188   : > { %v3399_v19 = vpop.eup %3398  ;;  %v1444_v20 = vadd.f32 %v3791_v23, %v1078_v16  ;;  %3334 = vmatprep.subr.bf16.mxu0 %v3489_v61 }
 0x189   : > { %3408 = vtanh.f32 %v1439_v17  ;;  %v3332_v21 = vpack.c.bf16 %v3399_v19, %v3397_v15 }
 0x18a   : > { %3410 = vtanh.f32 %v1444_v20  ;;  %3115 = vmatmul.mubr.msk.f32.vlgmr.msra.gmra.mrb[32].mxu0 %vm327_vm0, %v3840_v18  ;;  %v1093_v22 = vpop.permute.xlu0 %1092 }
 0x18b   : > { %v3401_v43 = vpop.eup %3400  ;;  %v1098_v24 = vpop.permute.xlu1 %1097  ;;  %v1524_v44 = vadd.f32 %v3797_v26, %v1093_v22  ;;  %3333 = vmatpush3.bf16.msra.mxu1 %v3332_v21  ;;  %3136 = vmatprep.mubr.msk.f32.mxu0 %vm3490_vm1, %v3491_v0 }
 0x18c   : > { %v3403_v45 = vpop.eup %3402  ;;  %v1529_v23 = vadd.f32 %v3795_v25, %v1098_v24  ;;  %3340 = vmatprep.subr.bf16.mxu1 %v3489_v61 }
 0x18d   : > { %3412 = vtanh.f32 %v1524_v44  ;;  %v3335_v46 = vpack.c.bf16 %v3403_v45, %v3401_v43 }
 0x18e   : > { %3414 = vtanh.f32 %v1529_v23  ;;  %3126 = vmatmul.mubr.msk.f32.vlgmr.msra.gmra.mrb[32].mxu1 %vm327_vm0, %v3840_v18  ;;  %v1103_v47 = vpop.permute.xlu0 %1102 }
 0x18f   : > { %v3405_v48 = vpop.eup %3404  ;;  %v1108_v49 = vpop.permute.xlu1 %1107  ;;  %v1599_v26 = vadd.f32 %v3801_v28, %v1103_v47  ;;  %3336 = vmatpush3.bf16.msra.mxu0 %v3335_v46  ;;  %3147 = vmatprep.mubr.msk.f32.mxu1 %vm3490_vm1, %v3491_v0 }
 0x190   : > { %v3407_v50 = vpop.eup %3406  ;;  %v1604_v25 = vadd.f32 %v3799_v27, %v1108_v49  ;;  %3337 = vmatprep.subr.bf16.mxu0 %v3489_v61 }
 0x191   : > { %3416 = vtanh.f32 %v1599_v26  ;;  %v3341_v51 = vpack.c.bf16 %v3407_v50, %v3405_v48 }
 0x192   : > { %3418 = vtanh.f32 %v1604_v25  ;;  %v1123_v52 = vpop.permute.xlu0 %1122 }
 0x193   : > { %v3409_v53 = vpop.eup %3408  ;;  %v1128_v54 = vpop.permute.xlu1 %1127  ;;  %v1684_v55 = vadd.f32 %v3805_v30, %v1123_v52  ;;  %3342 = vmatpush3.bf16.msra.mxu1 %v3341_v51 }
 0x194   : > { %v3411_v56 = vpop.eup %3410  ;;  %v1689_v28 = vadd.f32 %v3803_v29, %v1128_v54  ;;  %3343 = vmatprep.subr.bf16.mxu1 %v3489_v61 }
 0x195   : > { %3420 = vtanh.f32 %v1684_v55  ;;  %v3338_v57 = vpack.c.bf16 %v3411_v56, %v3409_v53 }
 0x196   : > { %3422 = vtanh.f32 %v1689_v28  ;;  %v1113_v27 = vpop.permute.xlu0 %1112 }
 0x197   : > { %v3413_v58 = vpop.eup %3412  ;;  %v1118_v59 = vpop.permute.xlu1 %1117  ;;  %v1609_v60 = vadd.f32 %v3809_v32, %v1113_v27  ;;  %3339 = vmatpush3.bf16.msra.mxu0 %v3338_v57 }
 0x198   : > { %v3415_v62 = vpop.eup %3414  ;;  %v1614_v63 = vadd.f32 %v3807_v31, %v1118_v59  ;;  %3346 = vmatprep.subr.bf16.mxu0 %v3489_v61 }
 0x199   : > { %3424 = vtanh.f32 %v1609_v60  ;;  %v3344_v30 = vpack.c.bf16 %v3415_v62, %v3413_v58 }
 0x19a   : > { %3426 = vtanh.f32 %v1614_v63  ;;  %3137 = vmatmul.mubr.msk.f32.vlgmr.msra.gmra.mrb[34].mxu0 %vm327_vm0, %v3840_v18  ;;  %v1133_v29 = vpop.permute.xlu0 %1132 }
 0x19b   : > { %v3417_v1 = vpop.eup %3416  ;;  %v1138_v2 = vpop.permute.xlu1 %1137  ;;  %v1694_v3 = vadd.f32 %v3813_v34, %v1133_v29  ;;  %3345 = vmatpush3.bf16.msra.mxu1 %v3344_v30  ;;  %3158 = vmatprep.mubr.msk.f32.mxu0 %vm3490_vm1, %v3491_v0 }
 0x19c   : > { %v3419_v32 = vpop.eup %3418  ;;  %v1699_v31 = vadd.f32 %v3811_v33, %v1138_v2  ;;  %3352 = vmatprep.subr.bf16.mxu1 %v3489_v61 }
 0x19d   : > { %3428 = vtanh.f32 %v1694_v3  ;;  %v3347_v4 = vpack.c.bf16 %v3419_v32, %v3417_v1 }
 0x19e   : > { %3430 = vtanh.f32 %v1699_v31  ;;  %3148 = vmatmul.mubr.msk.f32.vlgmr.msra.gmra.mrb[34].mxu1 %vm327_vm0, %v3840_v18  ;;  %v1143_v5 = vpop.permute.xlu0 %1142 }
 0x19f   : > { %v3421_v6 = vpop.eup %3420  ;;  %v1148_v7 = vpop.permute.xlu1 %1147  ;;  %v1769_v34 = vadd.f32 %v3817_v36, %v1143_v5  ;;  %3348 = vmatpush3.bf16.msra.mxu0 %v3347_v4  ;;  %3169 = vmatprep.mubr.msk.f32.mxu1 %vm3490_vm1, %v3491_v0 }
 0x1a0   : > { %v3423_v8 = vpop.eup %3422  ;;  %v1774_v33 = vadd.f32 %v3815_v35, %v1148_v7  ;;  %3349 = vmatprep.subr.bf16.mxu0 %v3489_v61 }
 0x1a1   : > { %3432 = vtanh.f32 %v1769_v34  ;;  %v3353_v9 = vpack.c.bf16 %v3423_v8, %v3421_v6 }
 0x1a2   : > { %3434 = vtanh.f32 %v1774_v33  ;;  %v1163_v10 = vpop.permute.xlu0 %1162 }
 0x1a3   : > { %v3425_v11 = vpop.eup %3424  ;;  %v1168_v12 = vpop.permute.xlu1 %1167  ;;  %v1854_v13 = vadd.f32 %v3821_v38, %v1163_v10  ;;  %3354 = vmatpush3.bf16.msra.mxu1 %v3353_v9 }
 0x1a4   : > { %v3427_v14 = vpop.eup %3426  ;;  %v1859_v36 = vadd.f32 %v3819_v37, %v1168_v12  ;;  %3355 = vmatprep.subr.bf16.mxu1 %v3489_v61 }
 0x1a5   : > { %3436 = vtanh.f32 %v1854_v13  ;;  %v3350_v15 = vpack.c.bf16 %v3427_v14, %v3425_v11 }
 0x1a6   : > { %3438 = vtanh.f32 %v1859_v36  ;;  %v1153_v35 = vpop.permute.xlu0 %1152 }
 0x1a7   : > { %v3429_v16 = vpop.eup %3428  ;;  %v1158_v17 = vpop.permute.xlu1 %1157  ;;  %v1779_v19 = vadd.f32 %v3825_v40, %v1153_v35  ;;  %3351 = vmatpush3.bf16.msra.mxu0 %v3350_v15 }
 0x1a8   : > { %v3431_v20 = vpop.eup %3430  ;;  %v1784_v21 = vadd.f32 %v3823_v39, %v1158_v17  ;;  %3358 = vmatprep.subr.bf16.mxu0 %v3489_v61 }
 0x1a9   : > { %3440 = vtanh.f32 %v1779_v19  ;;  %v3356_v38 = vpack.c.bf16 %v3431_v20, %v3429_v16 }
 0x1aa   : > { %3442 = vtanh.f32 %v1784_v21  ;;  %3159 = vmatmul.mubr.msk.f32.vlgmr.msra.gmra.mrb[36].mxu0 %vm327_vm0, %v3840_v18  ;;  %v1173_v37 = vpop.permute.xlu0 %1172 }
 0x1ab   : > { %v3433_v22 = vpop.eup %3432  ;;  %v1178_v43 = vpop.permute.xlu1 %1177  ;;  %v1864_v24 = vadd.f32 %v3829_v42, %v1173_v37  ;;  %3357 = vmatpush3.bf16.msra.mxu1 %v3356_v38  ;;  %3180 = vmatprep.mubr.msk.f32.mxu0 %vm3490_vm1, %v3491_v0 }
 0x1ac   : > { %v3435_v40 = vpop.eup %3434  ;;  %v1869_v39 = vadd.f32 %v3827_v41, %v1178_v43  ;;  %3364 = vmatprep.subr.bf16.mxu1 %v3489_v61 }
 0x1ad   : > { %3444 = vtanh.f32 %v1864_v24  ;;  %v3359_v44 = vpack.c.bf16 %v3435_v40, %v3433_v22 }
 0x1ae   : > { %3446 = vtanh.f32 %v1869_v39  ;;  %3170 = vmatmul.mubr.msk.f32.vlgmr.msra.gmra.mrb[36].mxu1 %vm327_vm0, %v3840_v18 }
 0x1af   : > { %v3437_v45 = vpop.eup %3436  ;;  %3360 = vmatpush3.bf16.msra.mxu0 %v3359_v44  ;;  %3191 = vmatprep.mubr.msk.f32.mxu1 %vm3490_vm1, %v3491_v0 }
 0x1b0   : > { %v3439_v42 = vpop.eup %3438  ;;  %3361 = vmatprep.subr.bf16.mxu0 %v3489_v61 }
 0x1b1   : > { %v3365_v23 = vpack.c.bf16 %v3439_v42, %v3437_v45 }
 0x1b3   : > { %v3441_v46 = vpop.eup %3440  ;;  %3366 = vmatpush3.bf16.msra.mxu1 %v3365_v23 }
 0x1b4   : > { %v3443_v41 = vpop.eup %3442  ;;  %3367 = vmatprep.subr.bf16.mxu1 %v3489_v61 }
 0x1b5   : > { %v3362_v47 = vpack.c.bf16 %v3443_v41, %v3441_v46 }
 0x1b7   : > { %v3445_v48 = vpop.eup %3444  ;;  %3363 = vmatpush3.bf16.msra.mxu0 %v3362_v47 }
 0x1b8   : > { %v3447_v49 = vpop.eup %3446 }
 0x1b9   : > { %v3368_v26 = vpack.c.bf16 %v3447_v49, %v3445_v48 }
 0x1ba   : > { %3181 = vmatmul.mubr.msk.f32.vlgmr.msra.gmra.mrb[38].mxu0 %vm327_vm0, %v3840_v18 }
 0x1bb   : > { %3369 = vmatpush3.bf16.msra.mxu1 %v3368_v26 }
 0x1be   : > { %3192 = vmatmul.mubr.msk.f32.vlgmr.msra.gmra.mrb[38].mxu1 %vm327_vm0, %v3840_v18 }
 0x25d   : > { %v1973_v0 = vpop.f32.mrb[32].mxu0 }
 0x25e   : > { %v2468_v50 = vsel %vm2467_vm2, %v1973_v0, -inf  ;;  %v3116_v25 = vpop.f32.mrb[33].mxu0 }
 0x25f   : > { %2469 = vmax.xlane.f32.xlu0 %v2468_v50 }
 0x261   : > { %v2043_v51 = vpop.f32.mrb[32].mxu1 }
 0x262   : > { %v2471_v61 = vsel %vm2467_vm2, %v2043_v51, -inf  ;;  %v3127_v52 = vpop.f32.mrb[33].mxu1 }
 0x263   : > { %2472 = vmax.xlane.f32.xlu1 %v2471_v61 }
 0x26d   : > { %v2113_v53 = vpop.f32.mrb[34].mxu0 }
 0x26e   : > { %v2474_v54 = vsel %vm2467_vm2, %v2113_v53, -inf  ;;  %v3138_v55 = vpop.f32.mrb[35].mxu0 }
 0x26f   : > { %2475 = vmax.xlane.f32.xlu0 %v2474_v54 }
 0x271   : > { %v2183_v56 = vpop.f32.mrb[34].mxu1 }
 0x272   : > { %v2477_v28 = vsel %vm2467_vm2, %v2183_v56, -inf  ;;  %v3149_v18 = vpop.f32.mrb[35].mxu1 }
 0x273   : > { %2478 = vmax.xlane.f32.xlu0 %v2477_v28 }
 0x27d   : > { %v2253_v57 = vpop.f32.mrb[36].mxu0 }
 0x27e   : > { %v2480_v27 = vsel %vm2467_vm2, %v2253_v57, -inf  ;;  %v3160_v58 = vpop.f32.mrb[37].mxu0 }
 0x27f   : > { %2481 = vmax.xlane.f32.xlu1 %v2480_v27 }
 0x281   : > { %v2323_v59 = vpop.f32.mrb[36].mxu1 }
 0x282   : > { %v2483_v60 = vsel %vm2467_vm2, %v2323_v59, -inf  ;;  %v3171_v62 = vpop.f32.mrb[37].mxu1 }
 0x283   : > { %2484 = vmax.xlane.f32.xlu0 %v2483_v60 }
 0x28d   : > { %v2393_v63 = vpop.f32.mrb[38].mxu0 }
 0x28e   : > { %v2486_v30 = vsel %vm2467_vm2, %v2393_v63, -inf  ;;  %v3182_v29 = vpop.f32.mrb[39].mxu0 }
 0x28f   : > { %2487 = vmax.xlane.f32.xlu1 %v2486_v30 }
 0x291   : > { %v2463_v1 = vpop.f32.mrb[38].mxu1 }
 0x292   : > { %v3193_v2 = vpop.f32.mrb[39].mxu1  ;;  %v2489_v3 = vsel %vm2467_vm2, %v2463_v1, -inf }
 0x293   : > { %2490 = vmax.xlane.f32.xlu0 %v2489_v3 }
 0x2ec   : > { %v2470_v32 = vpop.xlane.xlu0 %2469 }
 0x2ed   : > { %v2492_v31 = vsub.f32 %v1973_v0, %v2470_v32 }
 0x2ef   : > { %v2500_v4 = vmul.f32 1.442695, %v2492_v31 }
 0x2f0   : > { %v2473_v5 = vpop.xlane.xlu1 %2472 }
 0x2f1   : > { %3448 = vpow2.f32 %v2500_v4  ;;  %v2493_v6 = vsub.f32 %v2043_v51, %v2473_v5 }
 0x2f3   : > { %v2502_v7 = vmul.f32 1.442695, %v2493_v6 }
 0x2f5   : > { %3450 = vpow2.f32 %v2502_v7 }
 0x2fb   : > { %v3449_v34 = vpop.eup %3448 }
 0x2fc   : > { %v2476_v8 = vpop.xlane.xlu0 %2475  ;;  %v2516_v33 = vsel %vm2467_vm2, %v3449_v34, 0.0 }
 0x2fd   : > { %v2494_v9 = vsub.f32 %v2113_v53, %v2476_v8  ;;  %2517 = vadd.xlane.f32.xlu1 %v2516_v33 }
 0x2ff   : > { %v3451_v10 = vpop.eup %3450  ;;  %v2504_v11 = vmul.f32 1.442695, %v2494_v9 }
 0x300   : > { %v2479_v12 = vpop.xlane.xlu0 %2478  ;;  %v2519_v13 = vsel %vm2467_vm2, %v3451_v10, 0.0 }
 0x301   : > { %3452 = vpow2.f32 %v2504_v11  ;;  %v2495_v14 = vsub.f32 %v2183_v56, %v2479_v12  ;;  %2520 = vadd.xlane.f32.xlu0 %v2519_v13 }
 0x303   : > { %v2506_v36 = vmul.f32 1.442695, %v2495_v14 }
 0x305   : > { %3454 = vpow2.f32 %v2506_v36 }
 0x30b   : > { %v3453_v15 = vpop.eup %3452 }
 0x30c   : > { %v2482_v35 = vpop.xlane.xlu1 %2481  ;;  %v2522_v16 = vsel %vm2467_vm2, %v3453_v15, 0.0 }
 0x30d   : > { %v2496_v17 = vsub.f32 %v2253_v57, %v2482_v35  ;;  %2523 = vadd.xlane.f32.xlu1 %v2522_v16 }
 0x30f   : > { %v3455_v19 = vpop.eup %3454  ;;  %v2508_v20 = vmul.f32 1.442695, %v2496_v17 }
 0x310   : > { %v2485_v21 = vpop.xlane.xlu0 %2484  ;;  %v2525_v38 = vsel %vm2467_vm2, %v3455_v19, 0.0 }
 0x311   : > { %3456 = vpow2.f32 %v2508_v20  ;;  %v2497_v37 = vsub.f32 %v2323_v59, %v2485_v21  ;;  %2526 = vadd.xlane.f32.xlu0 %v2525_v38 }
 0x313   : > { %v2510_v22 = vmul.f32 1.442695, %v2497_v37 }
 0x315   : > { %3458 = vpow2.f32 %v2510_v22 }
 0x31b   : > { %v3457_v43 = vpop.eup %3456 }
 0x31c   : > { %v2488_v24 = vpop.xlane.xlu1 %2487  ;;  %v2528_v40 = vsel %vm2467_vm2, %v3457_v43, 0.0 }
 0x31d   : > { %v2498_v39 = vsub.f32 %v2393_v63, %v2488_v24  ;;  %2529 = vadd.xlane.f32.xlu1 %v2528_v40 }
 0x31f   : > { %v3459_v44 = vpop.eup %3458  ;;  %v2512_v45 = vmul.f32 1.442695, %v2498_v39 }
 0x320   : > { %v2491_v42 = vpop.xlane.xlu0 %2490  ;;  %v2531_v23 = vsel %vm2467_vm2, %v3459_v44, 0.0 }
 0x321   : > { %3460 = vpow2.f32 %v2512_v45  ;;  %v2499_v46 = vsub.f32 %v2463_v1, %v2491_v42  ;;  %2532 = vadd.xlane.f32.xlu0 %v2531_v23 }
 0x323   : > { %v2514_v41 = vmul.f32 1.442695, %v2499_v46 }
 0x325   : > { %3462 = vpow2.f32 %v2514_v41 }
 0x32b   : > { %v3461_v47 = vpop.eup %3460 }
 0x32c   : > { %v2534_v48 = vsel %vm2467_vm2, %v3461_v47, 0.0 }
 0x32d   : > { %2535 = vadd.xlane.f32.xlu1 %v2534_v48 }
 0x32f   : > { %v3463_v49 = vpop.eup %3462 }
 0x330   : > { %v2537_v26 = vsel %vm2467_vm2, %v3463_v49, 0.0 }
 0x331   : > { %2538 = vadd.xlane.f32.xlu0 %v2537_v26 }
 0x38a   : > { %v2518_v0 = vpop.xlane.xlu1 %2517 }
 0x38b   : > { %3464 = vrcp.f32 %v2518_v0 }
 0x38e   : > { %v2521_v50 = vpop.xlane.xlu0 %2520 }
 0x38f   : > { %3466 = vrcp.f32 %v2521_v50 }
 0x395   : > { %v3465_v25 = vpop.eup %3464 }
 0x396   : > { %v2541_v51 = vmul.f32 %v3465_v25, %v3449_v34 }
 0x398   : > { %2556 = vst.msk [vmem:[%s3921_s25] sm:$0x1] %vm2467_vm2, %v2541_v51 }
 0x399   : > { %v3467_v61 = vpop.eup %3466 }
 0x39a   : > { %v2543_v52 = vmul.f32 %v3467_v61, %v3451_v10  ;;  %v2524_v53 = vpop.xlane.xlu1 %2523 }
 0x39b   : > { %3468 = vrcp.f32 %v2524_v53 }
 0x39c   : > { %2557 = vst.msk [vmem:[%s3921_s25 + $0x1] sm:$0x1] %vm2467_vm2, %v2543_v52 }
 0x39e   : > { %v2527_v54 = vpop.xlane.xlu0 %2526 }
 0x39f   : > { %3470 = vrcp.f32 %v2527_v54 }
 0x3a5   : > { %v3469_v55 = vpop.eup %3468 }
 0x3a6   : > { %v2545_v56 = vmul.f32 %v3469_v55, %v3453_v15 }
 0x3a8   : > { %2558 = vst.msk [vmem:[%s3921_s25 + $0x2] sm:$0x1] %vm2467_vm2, %v2545_v56 }
 0x3a9   : > { %v3471_v28 = vpop.eup %3470 }
 0x3aa   : > { %v2547_v18 = vmul.f32 %v3471_v28, %v3455_v19  ;;  %v2530_v57 = vpop.xlane.xlu1 %2529 }
 0x3ab   : > { %3472 = vrcp.f32 %v2530_v57 }
 0x3ac   : > { %2559 = vst.msk [vmem:[%s3921_s25 + $0x3] sm:$0x1] %vm2467_vm2, %v2547_v18 }
 0x3ae   : > { %v2533_v27 = vpop.xlane.xlu0 %2532 }
 0x3af   : > { %3474 = vrcp.f32 %v2533_v27 }
 0x3b5   : > { %v3473_v58 = vpop.eup %3472 }
 0x3b6   : > { %v2549_v59 = vmul.f32 %v3473_v58, %v3457_v43 }
 0x3b8   : > { %2560 = vst.msk [vmem:[%s3921_s25 + $0x4] sm:$0x1] %vm2467_vm2, %v2549_v59 }
 0x3b9   : > { %v3475_v60 = vpop.eup %3474 }
 0x3ba   : > { %v2551_v62 = vmul.f32 %v3475_v60, %v3459_v44  ;;  %v2536_v63 = vpop.xlane.xlu1 %2535 }
 0x3bb   : > { %3476 = vrcp.f32 %v2536_v63 }
 0x3bc   : > { %2561 = vst.msk [vmem:[%s3921_s25 + $0x5] sm:$0x1] %vm2467_vm2, %v2551_v62 }
 0x3be   : > { %v2539_v30 = vpop.xlane.xlu0 %2538 }
 0x3bf   : > { %3478 = vrcp.f32 %v2539_v30 }
 0x3c5   : > { %v3477_v29 = vpop.eup %3476 }
 0x3c6   : > { %v2553_v1 = vmul.f32 %v3477_v29, %v3461_v47 }
 0x3c8   : > { %2562 = vst.msk [vmem:[%s3921_s25 + $0x6] sm:$0x1] %vm2467_vm2, %v2553_v1 }
 0x3c9   : > { %v3479_v2 = vpop.eup %3478 }
 0x3ca   : > { %v2555_v3 = vmul.f32 %v3479_v2, %v3463_v49 }
 0x3cc   : > { %2563 = vst.msk [vmem:[%s3921_s25 + $0x7] sm:$0x1] %vm2467_vm2, %v2555_v3 }
 0x3cd PF: > { %s15_s18 = sadd.s32 1, %s3486_s18  }
 0x3ce   : > { %p12_p4 = scmp.ge.s32.totalorder %s15_s18, 5  }
 0x3d0   :  { %14 = sbr.rel (!%p12_p4) target bundleno = 1 (0x1), region = 73 }

</bundles_post_ra>
